<compile_context>
chip_gen: v7x
topology: tpu7x:2x2x1
jax: 0.10.0
libtpu: 0.0.40
codegen_flags: <defaults>
</compile_context>

<pallas_src>
import jax
import jax.numpy as jnp
from jax.experimental import pallas as pl
from jax.experimental.pallas import tpu as pltpu


_CHUNK_THRESHOLD_BYTES = 8 * 1024 * 1024          # split into 2 DMAs above this
_ANY_SPEC = pl.BlockSpec(memory_space=pl.ANY)     # raw HBM ref, no auto-DMA


def _nbytes(x):
    return x.size * jnp.dtype(x.dtype).itemsize


def _cost(x):
    # Pure HBM traffic: read n bytes + write n bytes, zero flops.
    return pl.CostEstimate(flops=0, transcendentals=0,
                           bytes_accessed=2 * _nbytes(x))


def _dma_copy_whole(x):
    """One whole-ref HBM->HBM DMA (any shape/dtype, no VMEM round-trip)."""

    def kernel(x_hbm, o_hbm, sem):
        cp = pltpu.make_async_copy(x_hbm, o_hbm, sem)
        cp.start()
        cp.wait()

    return pl.pallas_call(
        kernel,
        out_shape=jax.ShapeDtypeStruct(x.shape, x.dtype),
        in_specs=[_ANY_SPEC],
        out_specs=_ANY_SPEC,
        scratch_shapes=(pltpu.SemaphoreType.DMA,),
        cost_estimate=_cost(x),
    )(x)


def _dma_copy_chunked(x, splits):
    """Concurrent HBM->HBM DMAs over disjoint leading-axis slices.

    `splits` is a static tuple of (start_row, num_rows). All DMAs are started
    back-to-back (separate semaphores, disjoint destinations) and then waited,
    letting multiple DMA streams drive HBM bandwidth on large copies.
    """

    def kernel(x_hbm, o_hbm, sems):
        copies = []
        for idx, (start, size) in enumerate(splits):
            cp = pltpu.make_async_copy(
                x_hbm.at[pl.ds(start, size)],
                o_hbm.at[pl.ds(start, size)],
                sems.at[idx],
            )
            cp.start()
            copies.append(cp)
        for cp in copies:
            cp.wait()

    return pl.pallas_call(
        kernel,
        out_shape=jax.ShapeDtypeStruct(x.shape, x.dtype),
        in_specs=[_ANY_SPEC],
        out_specs=_ANY_SPEC,
        scratch_shapes=(pltpu.SemaphoreType.DMA((len(splits),)),),
        cost_estimate=_cost(x),
    )(x)


def _materialized_copy(x):
    if x.ndim >= 1 and x.shape[0] >= 2 and _nbytes(x) >= _CHUNK_THRESHOLD_BYTES:
        rows = x.shape[0]
        half = rows // 2
        splits = ((0, half), (half, rows - half))
        return _dma_copy_chunked(x, splits)
    return _dma_copy_whole(x)


def identity(x, *, materialize=False):
    """Pallas equivalent of Identity.forward (Rn50's net_back.fc replacement).

    By default the copy is elided and x is returned unchanged — the op does
    zero math, so skipping the kernel entirely is the correct fast path.
    Pass materialize=True to force a fresh output buffer, produced by direct
    HBM->HBM DMA (no VMEM pipeline, no input/output aliasing hazards).
    """
    if not materialize or x.size == 0:
        return x
    return _materialized_copy(x)


if __name__ == "__main__":
    key = jax.random.PRNGKey(0)
    k1, k2, k3 = jax.random.split(key, 3)

    # Pooled-feature style input the Identity actually sees inside Rn50:
    # (batch, fc_in_features) with fc_in_features = 2048, small batch.
    feats = jax.random.normal(k1, (2, 2048), dtype=jnp.float32)
    y = jax.block_until_ready(identity(feats, materialize=True))
    assert y.shape == feats.shape and y.dtype == feats.dtype
    assert bool(jnp.all(y == feats))

    # Default (elided) path: pure pass-through, no kernel launch.
    y0 = identity(feats)
    assert y0 is feats

    # NCHW feature-map style input, f32 and bf16, via the whole-ref DMA path.
    x = jax.random.normal(k2, (2, 4, 16, 16), dtype=jnp.float32)
    yx = jax.block_until_ready(identity(x, materialize=True))
    assert yx.shape == x.shape and yx.dtype == x.dtype
    assert bool(jnp.all(yx == x))

    xb = x.astype(jnp.bfloat16)
    yb = jax.block_until_ready(identity(xb, materialize=True))
    assert yb.shape == xb.shape and yb.dtype == xb.dtype
    assert bool(jnp.all(yb == xb))

    # Odd-sized array: single whole-ref DMA, no pad/ravel/slice passes.
    x_odd = jax.random.normal(k3, (3, 5, 7), dtype=jnp.float32)
    yo = jax.block_until_ready(identity(x_odd, materialize=True))
    assert yo.shape == x_odd.shape and bool(jnp.all(yo == x_odd))

    # Explicitly exercise the chunked (two concurrent DMAs) path on a small
    # array so the large-copy code path is covered in this test.
    yc = jax.block_until_ready(_dma_copy_chunked(x, ((0, 1), (1, 1))))
    assert bool(jnp.all(yc == x))

    print("KERNEL_OK")
</pallas_src>

<mosaic_0001>
module attributes {stable_mosaic.version = 11 : i64} {
  func.func @kernel(%arg0: memref<2x2048xf32, #tpu.memory_space<any>>, %arg1: memref<2x2048xf32, #tpu.memory_space<any>>, %arg2: memref<!tpu.dma_semaphore, #tpu.memory_space<semaphore_mem>>) attributes {dimension_semantics = [], scalar_prefetch = 0 : i64, scratch_operands = 1 : i64, tpu.core_type = #tpu.core_type<tc>} {
    tpu.enqueue_dma source(%arg0 : memref<2x2048xf32, #tpu.memory_space<any>>) target(%arg1 : memref<2x2048xf32, #tpu.memory_space<any>>) target_semaphore(%arg2 : memref<!tpu.dma_semaphore, #tpu.memory_space<semaphore_mem>>)
    tpu.wait_dma2 semaphore(%arg2 : memref<!tpu.dma_semaphore, #tpu.memory_space<semaphore_mem>>) src(%arg0 : memref<2x2048xf32, #tpu.memory_space<any>>) dst(%arg1 : memref<2x2048xf32, #tpu.memory_space<any>>)
    return
  }
}

</mosaic_0001>

<bundles_post_ra>
// kernel: tpu_custom_call.1
= control target key start
LH: loop header
LB: loop body
LE: loop exit
PB: predicated region body
PF: predicated region fallthrough
CT: control target
= control target key end

     0   :  { %s35_s6 = smov [#allocation2]   ;;  %s36_s7 = smov [#allocation3]   ;;  %s54_s0 = inlined_call_operand.hbm [shape: f32[2,2048], index: 0, kind: input, shape index: {}]   ;;  %s55_s1 = inlined_call_operand.hbm [shape: f32[2,2048], index: 1, kind: output, shape index: {}]  }
   0x1   :  { %s37_s8 = smov 0  }
   0x2   :  { %18 = dma.general %s54_s0, 512, %s55_s1, %s35_s6, %s36_s7, [#allocation4], %s37_s8, 0  }
   0x3   :  { %33 = dma.done.wait [#allocation2], 512 }
   0x4   :  { %34 = vsyncadd [#allocation2], 4294966784 }
   0x5   :  { %23 = vsyncmov [#allocation2] }
   0x8   :  { %s24_s13 = vpop.sfrf %23 }
   0x9   :  { %p29_p0 = scmp.ne.s32.totalorder %s24_s13, 0 }
   0xb   :  { %28 = shalt.err (%p29_p0)  }

</bundles_post_ra>
